<compile_context>
chip_gen: v7x
topology: tpu7x:2x2x1
jax: 0.10.0
libtpu: 0.0.40
codegen_flags: <defaults>
</compile_context>

<pallas_src>
import functools

import jax
import jax.numpy as jnp
from jax.experimental import pallas as pl
from jax.experimental.pallas import tpu as pltpu

GAMMA = 1.5
ALPHA = 0.25
SUBLANES = 8
VREG_LANES = 128
MAX_LANES = 1024          # preferred lane-dense slab width
ROW_TILE_MAX = 256        # (256, 1024) f32 = 1 MiB per input tile


def _ceil_to(a, m):
    return -(-a // m) * m


# ----------------------------------------------------------------------------
# Element-wise math (shared by both kernels); inputs cast to f32 in-kernel.
# ----------------------------------------------------------------------------
def _qfocal_elementwise(x, y, gamma, alpha):
    """Per-element quality focal loss, EUP-lean formulation."""
    x = x.astype(jnp.float32)   # logits
    y = y.astype(jnp.float32)   # (soft) targets
    ax = jnp.abs(x)
    e = jnp.exp(-ax)                               # single shared EUP exp
    one_plus_e = 1.0 + e
    # sigmoid(x) = 1/(1+e) if x>=0 else e/(1+e), reusing e.
    inv = pl.reciprocal(one_plus_e, approx=True)   # EUP vrcp (cheap)
    # Two VPU Newton refinements -> f32-accurate sigmoid.  (Dropping one is a
    # v7x VALU micro-opt; kept here for accuracy margin vs the reference.)
    inv = inv * (2.0 - one_plus_e * inv)
    inv = inv * (2.0 - one_plus_e * inv)
    pred_prob = jnp.where(x >= 0.0, inv, e * inv)
    # BCEWithLogitsLoss(reduction='none'): max(x,0) - x*y + log1p(exp(-|x|))
    bce = jnp.maximum(x, 0.0) - x * y + jnp.log1p(e)
    alpha_factor = (1.0 - alpha) + y * (2.0 * alpha - 1.0)
    t = jnp.abs(y - pred_prob)
    if gamma == 1.5:
        mod = t * jnp.sqrt(t)                      # |y-p|**1.5 without pow
    elif gamma == 2.0:
        mod = t * t
    elif gamma == 1.0:
        mod = t
    else:
        # Generic gamma: guard t == 0 against log(0) -> NaN.
        mod = jnp.where(t > 0.0,
                        jnp.exp(gamma * jnp.log(jnp.maximum(t, 1e-38))), 0.0)
    return bce * alpha_factor * mod


def _qfocal_elementwise_jnp(x, y, gamma=GAMMA, alpha=ALPHA):
    """Plain-JAX version (reference + tiny tail handling)."""
    x = x.astype(jnp.float32)
    y = y.astype(jnp.float32)
    bce = jnp.maximum(x, 0.0) - x * y + jnp.log1p(jnp.exp(-jnp.abs(x)))
    p = jax.nn.sigmoid(x)
    af = y * alpha + (1.0 - y) * (1.0 - alpha)
    return bce * af * jnp.abs(y - p) ** gamma


# ----------------------------------------------------------------------------
# Kernels
# ----------------------------------------------------------------------------
def _qfocal_sum_kernel(pred_ref, true_ref, partial_ref, *, gamma, alpha,
                       row_tile, lanes, rows_last):
    """Streaming fold: per-tile (8, 128) partial sum, no loss map, no mask.

    The wrapper guarantees every tile is made of whole, valid 8-row chunks.
    A shorter last tile just runs fewer chunks (pl.when dual path below).
    """
    def fold_tile(n_rows):
        acc = None
        for r0 in range(0, n_rows, SUBLANES):          # fold-as-you-go
            loss = _qfocal_elementwise(pred_ref[r0:r0 + SUBLANES, :],
                                       true_ref[r0:r0 + SUBLANES, :],
                                       gamma, alpha)   # (8, lanes) f32
            acc = loss if acc is None else acc + loss
        # Fold lanes in vreg-aligned 128-wide chunks: (8, lanes) -> (8, 128).
        folded = acc[:, 0:VREG_LANES]
        for c0 in range(VREG_LANES, lanes, VREG_LANES):
            folded = folded + acc[:, c0:c0 + VREG_LANES]
        return folded

    if rows_last == row_tile:                          # all tiles identical
        partial_ref[...] = fold_tile(row_tile)
    else:                                              # only last tile shorter
        is_last = pl.program_id(0) == pl.num_programs(0) - 1

        @pl.when(jnp.logical_not(is_last))
        def _():
            partial_ref[...] = fold_tile(row_tile)

        @pl.when(is_last)
        def _():
            partial_ref[...] = fold_tile(rows_last)


def _qfocal_map_kernel(pred_ref, true_ref, loss_ref, *, gamma, alpha, row_tile):
    """reduction='none': write the loss map in 8-row slabs (bounded vregs)."""
    for r0 in range(0, row_tile, SUBLANES):
        loss = _qfocal_elementwise(pred_ref[r0:r0 + SUBLANES, :],
                                   true_ref[r0:r0 + SUBLANES, :],
                                   gamma, alpha)
        loss_ref[r0:r0 + SUBLANES, :] = loss.astype(loss_ref.dtype)


# ----------------------------------------------------------------------------
# Launch helpers
# ----------------------------------------------------------------------------
def _pick_row_tile(rows, row_tile):
    if row_tile is not None:
        return min(_ceil_to(max(int(row_tile), 1), SUBLANES), rows)
    if rows <= SUBLANES:
        return rows
    if rows <= 2 * ROW_TILE_MAX:
        # Prefer >= 2 grid steps so both v7x TensorCores get work.
        return min(_ceil_to(-(-rows // 2), SUBLANES), rows)
    return ROW_TILE_MAX


def _run_kernels(pred2d, true2d, reduction, gamma, alpha, row_tile, out_dtype):
    """pred2d/true2d: (rows, lanes) with rows % 8 == 0, lanes % 128 == 0."""
    rows, lanes = pred2d.shape
    tr = _pick_row_tile(rows, row_tile)
    num_tiles = -(-rows // tr)
    rows_last = rows - (num_tiles - 1) * tr            # multiple of 8, in (0, tr]

    in_specs = [pl.BlockSpec((tr, lanes), lambda i: (i, 0)),
                pl.BlockSpec((tr, lanes), lambda i: (i, 0))]
    # VMEM sized to need: 2 inputs x 2 buffers x tile (+ output) + slack.
    in_bytes = 2 * 2 * tr * lanes * pred2d.dtype.itemsize
    if reduction == "none":
        out_bytes = 2 * tr * lanes * jnp.dtype(out_dtype).itemsize
    else:
        out_bytes = 2 * SUBLANES * VREG_LANES * 4
    vmem_limit = int(max(16 << 20, in_bytes + out_bytes + (8 << 20)))
    cparams = pltpu.CompilerParams(
        dimension_semantics=("parallel",),             # independent tiles
        vmem_limit_bytes=vmem_limit)

    if reduction == "none":
        kernel = functools.partial(_qfocal_map_kernel, gamma=gamma,
                                   alpha=alpha, row_tile=tr)
        return pl.pallas_call(
            kernel,
            out_shape=jax.ShapeDtypeStruct((rows, lanes), out_dtype),
            grid_spec=pltpu.PrefetchScalarGridSpec(
                num_scalar_prefetch=0,
                grid=(num_tiles,),
                in_specs=in_specs,
                out_specs=pl.BlockSpec((tr, lanes), lambda i: (i, 0))),
            compiler_params=cparams,
        )(pred2d, true2d)

    kernel = functools.partial(_qfocal_sum_kernel, gamma=gamma, alpha=alpha,
                               row_tile=tr, lanes=lanes, rows_last=rows_last)
    partials = pl.pallas_call(
        kernel,
        out_shape=jax.ShapeDtypeStruct((num_tiles * SUBLANES, VREG_LANES),
                                       jnp.float32),
        grid_spec=pltpu.PrefetchScalarGridSpec(
            num_scalar_prefetch=0,
            grid=(num_tiles,),
            in_specs=in_specs,
            out_specs=pl.BlockSpec((SUBLANES, VREG_LANES), lambda i: (i, 0))),
        compiler_params=cparams,
    )(pred2d, true2d)
    return jnp.sum(partials)                           # tiny final reduce


def qfocal_loss(pred, true, *, gamma=GAMMA, alpha=ALPHA, reduction="mean",
                row_tile=None):
    """QFocalLoss(BCEWithLogitsLoss(reduction=<reduction>))(pred, true)."""
    orig_shape = pred.shape
    out_dtype = pred.dtype
    n = int(pred.size)
    if n == 0:
        if reduction == "none":
            return jnp.zeros(orig_shape, out_dtype)
        return jnp.zeros((), jnp.float32)

    pred_flat = pred.reshape(-1)                       # free bitcast
    true_flat = true.reshape(-1)

    # Zero-copy path: n % 1024 == 0 -> free reshape to a lane-dense slab with
    # rows % 8 == 0.  No padding, no slicing, no masking anywhere.
    lanes = None
    for cand in (MAX_LANES, 512, 256, VREG_LANES):
        if n % (SUBLANES * cand) == 0:
            lanes = cand
            break

    if lanes is not None:
        rows = n // lanes
        out = _run_kernels(pred_flat.reshape(rows, lanes),
                           true_flat.reshape(rows, lanes),
                           reduction, gamma, alpha, row_tile, out_dtype)
        if reduction == "none":
            return out.reshape(orig_shape)
        return out / n if reduction == "mean" else out

    # Fallback (n not a multiple of 1024): kernel on the multiple-of-8192
    # bulk, tiny (<8192 element) tail in plain JAX.  Still no jnp.pad and no
    # full-size output slice/cast.
    m = (n // (SUBLANES * MAX_LANES)) * (SUBLANES * MAX_LANES)
    tail_loss = _qfocal_elementwise_jnp(pred_flat[m:], true_flat[m:],
                                        gamma, alpha)

    if m == 0:                                         # too small for a tile
        if reduction == "none":
            return tail_loss.astype(out_dtype).reshape(orig_shape)
        total = jnp.sum(tail_loss)
        return total / n if reduction == "mean" else total

    rows = m // MAX_LANES
    out = _run_kernels(pred_flat[:m].reshape(rows, MAX_LANES),
                       true_flat[:m].reshape(rows, MAX_LANES),
                       reduction, gamma, alpha, row_tile, out_dtype)
    if reduction == "none":
        full = jnp.concatenate([out.reshape(-1), tail_loss.astype(out_dtype)])
        return full.reshape(orig_shape)
    total = out + jnp.sum(tail_loss)
    return total / n if reduction == "mean" else total


# ----------------------------------------------------------------------------
# Reference + tests
# ----------------------------------------------------------------------------
def _qfocal_ref(pred, true, *, gamma=GAMMA, alpha=ALPHA, reduction="mean"):
    loss = _qfocal_elementwise_jnp(pred, true, gamma, alpha)
    if reduction == "mean":
        return loss.mean()
    if reduction == "sum":
        return loss.sum()
    return loss


if __name__ == "__main__":
    key = jax.random.PRNGKey(0)
    k1, k2, k3, k4, k5, k6 = jax.random.split(key, 6)

    # Case 1: small NCHW logits / soft targets (zero-copy path, lanes=256).
    B, C, H, W = 2, 4, 16, 16
    pred = jax.random.normal(k1, (B, C, H, W), dtype=jnp.float32) * 2.0
    true = jax.random.uniform(k2, (B, C, H, W), dtype=jnp.float32)

    out_mean = jax.block_until_ready(qfocal_loss(pred, true, reduction="mean"))
    ref_mean = _qfocal_ref(pred, true, reduction="mean")
    assert jnp.allclose(out_mean, ref_mean, rtol=1e-4, atol=1e-6), (out_mean, ref_mean)

    out_sum = jax.block_until_ready(qfocal_loss(pred, true, reduction="sum"))
    ref_sum = _qfocal_ref(pred, true, reduction="sum")
    assert jnp.allclose(out_sum, ref_sum, rtol=1e-4, atol=1e-5), (out_sum, ref_sum)

    out_map = jax.block_until_ready(qfocal_loss(pred, true, reduction="none"))
    ref_map = _qfocal_ref(pred, true, reduction="none")
    assert out_map.shape == pred.shape and out_map.dtype == pred.dtype
    assert jnp.allclose(out_map, ref_map, rtol=1e-4, atol=1e-6)

    # Case 2: larger map -> lanes=1024, >= 2 grid steps and a shorter last
    # tile (exercises the pl.when dual path + parallel grid sharding).
    pred2 = jax.random.normal(k3, (2, 3, 64, 64), dtype=jnp.float32) * 2.0
    true2 = jax.random.uniform(k4, (2, 3, 64, 64), dtype=jnp.float32)
    out2 = jax.block_until_ready(qfocal_loss(pred2, true2, reduction="mean"))
    ref2 = _qfocal_ref(pred2, true2, reduction="mean")
    assert jnp.allclose(out2, ref2, rtol=1e-4, atol=1e-6), (out2, ref2)
    out2s = jax.block_until_ready(
        qfocal_loss(pred2, true2, reduction="sum", row_tile=8))
    ref2s = _qfocal_ref(pred2, true2, reduction="sum")
    assert jnp.allclose(out2s, ref2s, rtol=1e-4, atol=1e-4), (out2s, ref2s)

    # Case 3: element count not a multiple of 1024 -> kernel on the bulk,
    # tiny tail in plain JAX (no padding anywhere).
    pred3 = jax.random.normal(k5, (2, 3, 40, 52), dtype=jnp.float32) * 2.0
    true3 = jax.random.uniform(k6, (2, 3, 40, 52), dtype=jnp.float32)
    out3 = jax.block_until_ready(qfocal_loss(pred3, true3, reduction="mean"))
    ref3 = _qfocal_ref(pred3, true3, reduction="mean")
    assert jnp.allclose(out3, ref3, rtol=1e-4, atol=1e-6), (out3, ref3)
    out3m = jax.block_until_ready(qfocal_loss(pred3, true3, reduction="none"))
    ref3m = _qfocal_ref(pred3, true3, reduction="none")
    assert jnp.allclose(out3m, ref3m, rtol=1e-4, atol=1e-6)

    print("KERNEL_OK")
</pallas_src>

<mosaic_0001>
module attributes {stable_mosaic.version = 11 : i64} {
  func.func @_qfocal_sum_kernel(%arg0: i32, %arg1: memref<8x256xf32, #tpu.memory_space<vmem>>, %arg2: memref<8x256xf32, #tpu.memory_space<vmem>>, %arg3: memref<8x128xf32, #tpu.memory_space<vmem>>) attributes {dimension_semantics = [#tpu.dimension_semantics<parallel>], iteration_bounds = array<i64: 1>, scalar_prefetch = 0 : i64, scratch_operands = 0 : i64, tpu.core_type = #tpu.core_type<tc>, window_params = [{transform_indices = @transform_0, window_bounds = array<i64: 8, 256>}, {transform_indices = @transform_1, window_bounds = array<i64: 8, 256>}, {transform_indices = @transform_2, window_bounds = array<i64: 8, 128>}]} {
    %c0 = arith.constant 0 : index
    %c0_0 = arith.constant 0 : index
    %0 = vector.load %arg1[%c0, %c0_0] : memref<8x256xf32, #tpu.memory_space<vmem>>, vector<8x256xf32>
    %c0_1 = arith.constant 0 : index
    %c0_2 = arith.constant 0 : index
    %1 = vector.load %arg2[%c0_1, %c0_2] : memref<8x256xf32, #tpu.memory_space<vmem>>, vector<8x256xf32>
    %2 = math.absf %0 : vector<8x256xf32>
    %cst = arith.constant 0.000000e+00 : f32
    %3 = vector.broadcast %cst : f32 to vector<8x256xf32>
    %4 = arith.subf %3, %2 : vector<8x256xf32>
    %5 = math.exp %4 : vector<8x256xf32>
    %cst_3 = arith.constant 1.000000e+00 : f32
    %6 = vector.broadcast %cst_3 : f32 to vector<8x256xf32>
    %7 = arith.addf %6, %5 : vector<8x256xf32>
    %8 = tpu.reciprocal %7 {approx = true} : vector<8x256xf32> -> vector<8x256xf32>
    %9 = arith.mulf %7, %8 : vector<8x256xf32>
    %cst_4 = arith.constant 2.000000e+00 : f32
    %10 = vector.broadcast %cst_4 : f32 to vector<8x256xf32>
    %11 = arith.subf %10, %9 : vector<8x256xf32>
    %12 = arith.mulf %8, %11 : vector<8x256xf32>
    %13 = arith.mulf %7, %12 : vector<8x256xf32>
    %cst_5 = arith.constant 2.000000e+00 : f32
    %14 = vector.broadcast %cst_5 : f32 to vector<8x256xf32>
    %15 = arith.subf %14, %13 : vector<8x256xf32>
    %16 = arith.mulf %12, %15 : vector<8x256xf32>
    %cst_6 = arith.constant 0.000000e+00 : f32
    %17 = vector.broadcast %cst_6 : f32 to vector<8x256xf32>
    %18 = arith.cmpf oge, %0, %17 : vector<8x256xf32>
    %19 = arith.mulf %5, %16 : vector<8x256xf32>
    %20 = arith.select %18, %16, %19 : vector<8x256xi1>, vector<8x256xf32>
    %cst_7 = arith.constant 0.000000e+00 : f32
    %21 = vector.broadcast %cst_7 : f32 to vector<8x256xf32>
    %22 = arith.maximumf %0, %21 : vector<8x256xf32>
    %23 = arith.mulf %0, %1 : vector<8x256xf32>
    %24 = arith.subf %22, %23 : vector<8x256xf32>
    %25 = math.log1p %5 : vector<8x256xf32>
    %26 = arith.addf %24, %25 : vector<8x256xf32>
    %cst_8 = arith.constant -5.000000e-01 : f32
    %27 = vector.broadcast %cst_8 : f32 to vector<8x256xf32>
    %28 = arith.mulf %1, %27 : vector<8x256xf32>
    %cst_9 = arith.constant 7.500000e-01 : f32
    %29 = vector.broadcast %cst_9 : f32 to vector<8x256xf32>
    %30 = arith.addf %29, %28 : vector<8x256xf32>
    %31 = arith.subf %1, %20 : vector<8x256xf32>
    %32 = math.absf %31 : vector<8x256xf32>
    %33 = math.sqrt %32 : vector<8x256xf32>
    %34 = arith.mulf %32, %33 : vector<8x256xf32>
    %35 = arith.mulf %26, %30 : vector<8x256xf32>
    %36 = arith.mulf %35, %34 : vector<8x256xf32>
    %37 = vector.extract_strided_slice %36 {offsets = [0, 0], sizes = [8, 128], strides = [1, 1]} : vector<8x256xf32> to vector<8x128xf32>
    %38 = vector.extract_strided_slice %36 {offsets = [0, 128], sizes = [8, 128], strides = [1, 1]} : vector<8x256xf32> to vector<8x128xf32>
    %39 = arith.addf %37, %38 : vector<8x128xf32>
    %c0_10 = arith.constant 0 : index
    %c0_11 = arith.constant 0 : index
    %40 = vector.load %arg3[%c0_10, %c0_11] : memref<8x128xf32, #tpu.memory_space<vmem>>, vector<8x128xf32>
    tpu.vector_store %arg3[%c0_10, %c0_11], %39 {strides = array<i32>} : memref<8x128xf32, #tpu.memory_space<vmem>>, vector<8x128xf32>,
    return
  }
  func.func @transform_0(%arg0: i32) -> (i32, i32) {
    %c0_i32 = arith.constant 0 : i32
    %c0_i32_0 = arith.constant 0 : i32
    return %arg0, %c0_i32 : i32, i32
  }
  func.func @transform_1(%arg0: i32) -> (i32, i32) {
    %c0_i32 = arith.constant 0 : i32
    %c0_i32_0 = arith.constant 0 : i32
    return %arg0, %c0_i32 : i32, i32
  }
  func.func @transform_2(%arg0: i32) -> (i32, i32) {
    %c0_i32 = arith.constant 0 : i32
    %c0_i32_0 = arith.constant 0 : i32
    return %arg0, %c0_i32 : i32, i32
  }
}

</mosaic_0001>

<bundles_post_ra>
// kernel: tpu_custom_call.1
= control target key start
LH: loop header
LB: loop body
LE: loop exit
PB: predicated region body
PF: predicated region fallthrough
CT: control target
= control target key end

     0   :  { %7 = vsyncpa [#allocation3], 0  ;;  %s299_s0 = inlined_call_operand.hbm [shape: f32[8,256], index: 0, kind: input, shape index: {}]   ;;  %s300_s1 = inlined_call_operand.hbm [shape: f32[8,256], index: 1, kind: input, shape index: {}]   ;;  %s301_s2 = inlined_call_operand.hbm [shape: f32[8,128], index: 2, kind: output, shape index: {}]  }
   0x1   :  { %8 = vsyncpa [#allocation6], 0 }
   0x2   :  { %9 = vsyncpa [#allocation4], 0  ;;  %s233_s9 = smov [#allocation2]   ;;  %s234_s11 = smov [#allocation5]  }
   0x3   :  { %s16_s10 = sshll.u32 %s233_s9, 4  ;;  %s26_s12 = sshll.u32 %s234_s11, 4  ;;  %s17_s10 = int_to_ptr.vmem [resolvable:$true] %s16_s10  ;;  %s27_s12 = int_to_ptr.vmem [resolvable:$true] %s26_s12 }
   0x4   :  { %s161_s15 = scalar_lea.hbm %s299_s0, 256 }
   0x5   :  { %p162_p0 = scmp.ne.s32.totalorder %s299_s0, %s161_s15  ;;  %p165_p1 = scmp.lt.u32.totalorder %s161_s15, %s299_s0 }
   0x7   :  { %p167_p2 = pnand %p165_p1, %p162_p0 }
   0x9   :  { %170 = shalt.err (!%p167_p2)
}
   0xa   :  { %s171_s20 = scalar_lea.vmem %s17_s10, 256  ;;  %p176_p4 = scmp.lt.s32.totalorder %s17_s10, %s17_s10 }
   0xb   :  { %p172_p3 = scmp.ne.s32.totalorder %s17_s10, %s171_s20  ;;  %p177_p5 = scmp.lt.s32.totalorder %s171_s20, %s171_s20 }
   0xd   :  { %p178_p6 = por %p177_p5, %p176_p4 }
   0xf   :  { %p179_p7 = pnand %p178_p6, %p172_p3 }
  0x11   :  { %182 = shalt.err (!%p179_p7)
}
  0x12   :  { %19 = dma.hbm_to_vmem [thread:$0]  %s299_s0, 256, %s17_s10, [#allocation3]  }
  0x13   :  { %s183_s25 = scalar_lea.hbm %s300_s1, 256 }
  0x14   :  { %p184_p8 = scmp.ne.s32.totalorder %s300_s1, %s183_s25  ;;  %p187_p9 = scmp.lt.u32.totalorder %s183_s25, %s300_s1 }
  0x16   :  { %p189_p10 = pnand %p187_p9, %p184_p8 }
  0x18   :  { %192 = shalt.err (!%p189_p10)
}
  0x19   :  { %s193_s30 = scalar_lea.vmem %s27_s12, 256  ;;  %p198_p12 = scmp.lt.s32.totalorder %s27_s12, %s27_s12 }
  0x1a   :  { %p194_p11 = scmp.ne.s32.totalorder %s27_s12, %s193_s30  ;;  %p199_p13 = scmp.lt.s32.totalorder %s193_s30, %s193_s30 }
  0x1c   :  { %p200_p0 = por %p199_p13, %p198_p12 }
  0x1e   :  { %p201_p1 = pnand %p200_p0, %p194_p11 }
  0x20   :  { %204 = shalt.err (!%p201_p1)
}
  0x21   :  { %29 = dma.hbm_to_vmem [thread:$0]  %s300_s1, 256, %s27_s12, [#allocation6]  }
  0x22   :  { %227 = dma.done.wait [#allocation3], 256  }
  0x23   :  { %228 = vsyncadd [#allocation3], 4294967040 }
  0x24   :  { %229 = dma.done.wait [#allocation6], 256  }
  0x25   :  { %230 = vsyncadd [#allocation6], 4294967040  ;;  %v275_v0 = vld [vmem:[#allocation2] sm:$0xff]  ;;  %v277_v1 = vld [vmem:[#allocation2 + $0x8] sm:$0xff]  ;;  %s235_s1 = smov [#allocation7]  }
  0x26   :  { %v40_v2 = vand.u32 2147483647, %v275_v0  ;;  %v41_v3 = vand.u32 2147483647, %v277_v1  ;;  %vm64_vm0 = vcmp.ge.f32.partialorder %v275_v0, 0.0  ;;  %v38_v26 = vld [vmem:[#allocation5] sm:$0xff] }
  0x27   :  { %vm65_vm1 = vcmp.ge.f32.partialorder %v277_v1, 0.0  ;;  %v39_v28 = vld [vmem:[#allocation5 + $0x8] sm:$0xff]  ;;  %v70_v44 = vmax.f32 %v275_v0, 0.0  ;;  %v72_v45 = vmul.f32 %v38_v26, %v275_v0  ;;  %v71_v46 = vmax.f32 %v277_v1, 0.0  ;;  %s132_s4 = sshll.u32 %s235_s1, 4  ;;  %s133_s4 = int_to_ptr.vmem [resolvable:$true] %s132_s4 }
  0x28   :  { %v42_v4 = vsub.f32 0.0, %v40_v2  ;;  %v43_v5 = vsub.f32 0.0, %v41_v3  ;;  %v73_v47 = vmul.f32 %v39_v28, %v277_v1  ;;  %v96_v53 = vmul.f32 -0.5, %v38_v26  ;;  %s205_s5 = scalar_lea.vmem %s133_s4, 128  ;;  %p210_p3 = scmp.lt.s32.totalorder %s133_s4, %s133_s4 }
  0x29   :  { %v74_v52 = vsub.f32 %v70_v44, %v72_v45  ;;  %v97_v56 = vmul.f32 -0.5, %v39_v28  ;;  %p206_p2 = scmp.ne.s32.totalorder %s133_s4, %s205_s5  ;;  %p211_p4 = scmp.lt.s32.totalorder %s205_s5, %s205_s5 }
  0x2a   :  { %v44_v6 = vmul.f32 1.442695, %v42_v4  ;;  %v46_v7 = vmul.f32 1.442695, %v43_v5  ;;  %v75_v54 = vsub.f32 %v71_v46, %v73_v47  ;;  %v98_v59 = vadd.f32 0.75, %v96_v53 }
  0x2b   :  { %v99_v62 = vadd.f32 0.75, %v97_v56  ;;  %p212_p5 = por %p211_p4, %p210_p3 }
  0x2c   :  { %145 = vpow2.f32 %v44_v6 }
  0x2d   :  { %147 = vpow2.f32 %v46_v7  ;;  %p213_p6 = pnand %p212_p5, %p206_p2 }
  0x36   :  { %v146_v8 = vpop.eup %145 }
  0x37   :  { %v148_v9 = vpop.eup %147  ;;  %v48_v10 = vadd.f32 1.0, %v146_v8  ;;  %v79_v30 = vmul.f32 -0.5, %v146_v8  ;;  %v82_v39 = vand.u32 2147483647, %v146_v8 }
  0x38   :  { %v49_v11 = vadd.f32 1.0, %v148_v9  ;;  %v88_v32 = vmul.f32 -0.5, %v148_v9  ;;  %v91_v43 = vand.u32 2147483647, %v148_v9 }
  0x39   :  { %149 = vrcp.f32 %v48_v10  ;;  %v80_v36 = vadd.f32 1.0, %v79_v30  ;;  %vm83_vm2 = vcmp.lt.f32.partialorder %v82_v39, 0.0004427343 }
  0x3a   :  { %151 = vrcp.f32 %v49_v11  ;;  %v89_v40 = vadd.f32 1.0, %v88_v32  ;;  %vm92_vm3 = vcmp.lt.f32.partialorder %v91_v43, 0.0004427343 }
  0x3b   :  { %153 = vlog2.f32 %v48_v10  ;;  %v81_v49 = vmul.f32 %v146_v8, %v80_v36 }
  0x3c   :  { %155 = vlog2.f32 %v49_v11  ;;  %v90_v51 = vmul.f32 %v148_v9, %v89_v40 }
  0x43   :  { %v150_v12 = vpop.eup %149 }
  0x44   :  { %v152_v13 = vpop.eup %151  ;;  %v52_v14 = vmul.f32 %v150_v12, %v48_v10 }
  0x45   :  { %v53_v15 = vmul.f32 %v152_v13, %v49_v11  ;;  %v154_v38 = vpop.eup %153 }
  0x46   :  { %v54_v16 = vsub.f32 2.0, %v52_v14  ;;  %v156_v42 = vpop.eup %155  ;;  %v78_v48 = vmul.f32 0.6931472, %v154_v38 }
  0x47   :  { %v55_v17 = vsub.f32 2.0, %v53_v15  ;;  %v87_v50 = vmul.f32 0.6931472, %v156_v42 }
  0x48   :  { %v56_v18 = vmul.f32 %v150_v12, %v54_v16  ;;  %v84_v55 = vsel %vm83_vm2, %v81_v49, %v78_v48 }
  0x49   :  { %v57_v19 = vmul.f32 %v152_v13, %v55_v17  ;;  %v93_v57 = vsel %vm92_vm3, %v90_v51, %v87_v50  ;;  %v94_v58 = vadd.f32 %v84_v55, %v74_v52 }
  0x4a   :  { %v58_v20 = vmul.f32 %v56_v18, %v48_v10  ;;  %v95_v61 = vadd.f32 %v93_v57, %v75_v54 }
  0x4b   :  { %v59_v21 = vmul.f32 %v57_v19, %v49_v11  ;;  %v120_v5 = vmul.f32 %v98_v59, %v94_v58 }
  0x4c   :  { %v60_v22 = vsub.f32 2.0, %v58_v20 }
  0x4d   :  { %v61_v23 = vsub.f32 2.0, %v59_v21 }
  0x4e   :  { %v62_v24 = vmul.f32 %v60_v22, %v56_v18 }
  0x4f   :  { %v63_v25 = vmul.f32 %v61_v23, %v57_v19 }
  0x50   :  { %v66_v27 = vmul.f32 %v146_v8, %v62_v24  ;;  %v121_v8 = vmul.f32 %v99_v62, %v95_v61 }
  0x51   :  { %v67_v29 = vmul.f32 %v148_v9, %v63_v25 }
  0x52   :  { %v68_v31 = vsel %vm64_vm0, %v62_v24, %v66_v27 }
  0x53   :  { %v69_v33 = vsel %vm65_vm1, %v63_v25, %v67_v29  ;;  %v100_v34 = vsub.f32 %v38_v26, %v68_v31 }
  0x54   :  { %v101_v35 = vsub.f32 %v39_v28, %v69_v33 }
  0x55   :  { %v102_v37 = vand.u32 2147483647, %v100_v34 }
  0x56   :  { %v103_v41 = vand.u32 2147483647, %v101_v35 }
  0x57   :  { %157 = vrsqrt.f32 %v102_v37  ;;  %vm106_vm4 = vcmp.eq.f32.partialorder %v102_v37, inf  ;;  %v109_v63 = vand.u32 2147483648, %v102_v37  ;;  %vm108_vm5 = vcmp.eq.f32.partialorder %v102_v37, 0.0 }
  0x58   :  { %159 = vrsqrt.f32 %v103_v41  ;;  %vm113_vm6 = vcmp.eq.f32.partialorder %v103_v41, inf  ;;  %v116_v2 = vand.u32 2147483648, %v103_v41  ;;  %vm115_vm7 = vcmp.eq.f32.partialorder %v103_v41, 0.0 }
  0x61   :  { %v158_v60 = vpop.eup %157 }
  0x62   :  { %v160_v0 = vpop.eup %159  ;;  %v105_v1 = vmul.f32 %v158_v60, %v102_v37 }
  0x63   :  { %v112_v3 = vmul.f32 %v160_v0, %v103_v41 }
  0x64   :  { %v107_v4 = vsel %vm106_vm4, %v102_v37, %v105_v1 }
  0x65   :  { %v110_v6 = vsel %vm108_vm5, %v109_v63, %v107_v4  ;;  %v114_v7 = vsel %vm113_vm6, %v103_v41, %v112_v3 }
  0x66   :  { %v117_v9 = vsel %vm115_vm7, %v116_v2, %v114_v7  ;;  %v118_v10 = vmul.f32 %v110_v6, %v102_v37 }
  0x67   :  { %v119_v11 = vmul.f32 %v117_v9, %v103_v41 }
  0x68   :  { %v122_v12 = vmul.f32 %v120_v5, %v118_v10 }
  0x69   :  { %v123_v13 = vmul.f32 %v121_v8, %v119_v11 }
  0x6b   :  { %v124_v14 = vadd.f32 %v123_v13, %v122_v12 }
  0x6d   :  { %125 = vst [vmem:[#allocation7] sm:$0xff] %v124_v14 }
  0x6e   :  { %216 = shalt.err (!%p213_p6)
}
  0x6f   :  { %s217_s8 = scalar_lea.hbm %s301_s2, 128 }
  0x70   :  { %p218_p7 = scmp.ne.s32.totalorder %s301_s2, %s217_s8  ;;  %p221_p8 = scmp.lt.u32.totalorder %s217_s8, %s301_s2 }
  0x72   :  { %p223_p9 = pnand %p221_p8, %p218_p7 }
  0x74   :  { %226 = shalt.err (!%p223_p9)
}
  0x75   :  { %135 = dma.vmem_to_hbm [thread:$0]  %s133_s4, 128, %s301_s2, [#allocation4]  }
  0x76   :  { %231 = dma.done.wait [#allocation4], 128  }
  0x77   :  { %232 = vsyncadd [#allocation4], 4294967168 }
  0x78   :  { %139 = vsyncpa [#allocation3], 1 }
  0x79   :  { %140 = vsyncpa [#allocation6], 1 }
  0x7a   :  { %141 = vsyncpa [#allocation4], 1 }

</bundles_post_ra>
